<compile_context>
chip_gen: v7x
topology: tpu7x:2x2x1
jax: 0.10.0
libtpu: 0.0.40
codegen_flags: <defaults>
</compile_context>

<pallas_src>
import functools

import jax
import jax.numpy as jnp
from jax.experimental import pallas as pl
from jax.experimental.pallas import tpu as pltpu


def _round_up(n, m):
    return ((n + m - 1) // m) * m


def _fwd_kernel(x_ref, w_ref, b_ref, o_ref, *, block_rows):
    # x: (TB, D) VMEM, w: (1, D) VMEM, b: (1,) SMEM scalar, o: (1, 1, TB) VMEM
    x = x_ref[...]
    w = w_ref[...]
    b = b_ref[0]
    logits = jnp.sum(x * w, axis=-1) + b            # (TB,), VPU mul + lane reduce
    y_pred = 1.0 / (1.0 + jnp.exp(-logits))         # exp on EUP; f32-safe sigmoid
    o_ref[...] = y_pred.reshape(1, 1, block_rows)   # lane-dense store


def _loss_kernel(x_ref, w_ref, b_ref, y_ref, o_ref, *, block_rows, batch):
    # Fused forward + MSE, accumulated across the batch grid in the resident
    # (1, 1) output block.  Padded rows (global row >= batch) are masked out.
    i = pl.program_id(0)

    @pl.when(i == 0)
    def _init():
        o_ref[...] = jnp.zeros_like(o_ref)

    x = x_ref[...]                                   # (TB, D)
    w = w_ref[...]                                   # (1, D)
    b = b_ref[0]
    logits = jnp.sum(x * w, axis=-1, keepdims=True) + b   # (TB, 1)
    y_pred = 1.0 / (1.0 + jnp.exp(-logits))
    diff = y_pred - y_ref[...]                       # (TB, 1)

    row = i * block_rows + jax.lax.broadcasted_iota(jnp.int32, (block_rows, 1), 0)
    sq = jnp.where(row < batch, diff * diff, 0.0)
    o_ref[...] = o_ref[...] + jnp.sum(sq)

    @pl.when(i == pl.num_programs(0) - 1)
    def _finalize():
        o_ref[...] = o_ref[...] * (1.0 / float(batch))


def torch_model_forward(x, weight, bias, y=None, *, block_rows=512):
    """Pallas equivalent of TorchModel.forward.

    x:      (B, D) float32
    weight: (1, D) float32  (torch nn.Linear weight layout, used untransposed)
    bias:   (1,)   float32
    y:      optional (B, 1) float32 target -> returns scalar MSE loss
    """
    x = x.astype(jnp.float32)
    B, D = x.shape
    w_row = weight.reshape(1, D).astype(jnp.float32)   # keep (1, D): no transpose
    b = bias.reshape(1).astype(jnp.float32)            # SMEM scalar

    # Batch tiling: multiple of 8 sublanes; 512 default keeps double-buffered
    # x tiles tiny even for large D (raise vmem_limit_bytes only if D is huge).
    tb = min(block_rows, _round_up(B, 8))
    b_pad = _round_up(B, tb)
    grid = b_pad // tb
    if b_pad != B:
        x = jnp.pad(x, ((0, b_pad - B), (0, 0)))

    x_spec = pl.BlockSpec((tb, D), lambda i: (i, 0))
    w_spec = pl.BlockSpec((1, D), lambda i: (0, 0))
    b_spec = pl.BlockSpec(memory_space=pltpu.MemorySpace.SMEM)

    if y is None:
        out = pl.pallas_call(
            functools.partial(_fwd_kernel, block_rows=tb),
            grid=(grid,),
            out_shape=jax.ShapeDtypeStruct((grid, 1, tb), jnp.float32),
            in_specs=[x_spec, w_spec, b_spec],
            out_specs=pl.BlockSpec((1, 1, tb), lambda i: (i, 0, 0)),
            compiler_params=pltpu.CompilerParams(
                dimension_semantics=("parallel",)),
        )(x, w_row, b)
        return out.reshape(b_pad, 1)[:B]

    y = y.astype(jnp.float32).reshape(B, 1)
    if b_pad != B:
        y = jnp.pad(y, ((0, b_pad - B), (0, 0)))
    loss = pl.pallas_call(
        functools.partial(_loss_kernel, block_rows=tb, batch=B),
        grid=(grid,),
        out_shape=jax.ShapeDtypeStruct((1, 1), jnp.float32),
        in_specs=[x_spec, w_spec, b_spec,
                  pl.BlockSpec((tb, 1), lambda i: (i, 0))],
        out_specs=pl.BlockSpec((1, 1), lambda i: (0, 0)),
        compiler_params=pltpu.CompilerParams(
            dimension_semantics=("arbitrary",)),   # accumulator across grid
    )(x, w_row, b, y)
    return loss[0, 0]


if __name__ == "__main__":
    key = jax.random.PRNGKey(0)
    k_x, k_w, k_b, k_y = jax.random.split(key, 4)

    batch = 8
    input_size = 32

    # Deterministic init mimicking nn.Linear default (uniform +/- 1/sqrt(D)).
    bound = 1.0 / (input_size ** 0.5)
    weight = jax.random.uniform(k_w, (1, input_size), jnp.float32, -bound, bound)
    bias = jax.random.uniform(k_b, (1,), jnp.float32, -bound, bound)

    x = jax.random.normal(k_x, (batch, input_size), jnp.float32)
    y = jax.random.uniform(k_y, (batch, 1), jnp.float32)

    # Single-tile path.
    y_pred = jax.block_until_ready(torch_model_forward(x, weight, bias))
    loss = jax.block_until_ready(torch_model_forward(x, weight, bias, y))

    ref_pred = jax.nn.sigmoid(x @ weight.T + bias)
    ref_loss = jnp.mean((ref_pred - y) ** 2)
    assert y_pred.shape == (batch, 1), "shape mismatch"
    assert jnp.allclose(y_pred, ref_pred, atol=1e-5), "prediction mismatch"
    assert jnp.allclose(loss, ref_loss, atol=1e-5), "loss mismatch"

    # Multi-tile path (grid > 1, padded batch masked in the loss).
    batch2 = 200
    x2 = jax.random.normal(jax.random.PRNGKey(1), (batch2, input_size), jnp.float32)
    y2 = jax.random.uniform(jax.random.PRNGKey(2), (batch2, 1), jnp.float32)
    y_pred2 = jax.block_until_ready(
        torch_model_forward(x2, weight, bias, block_rows=64))
    loss2 = jax.block_until_ready(
        torch_model_forward(x2, weight, bias, y2, block_rows=64))
    ref_pred2 = jax.nn.sigmoid(x2 @ weight.T + bias)
    ref_loss2 = jnp.mean((ref_pred2 - y2) ** 2)
    assert jnp.allclose(y_pred2, ref_pred2, atol=1e-5), "tiled prediction mismatch"
    assert jnp.allclose(loss2, ref_loss2, atol=1e-5), "tiled loss mismatch"

    print("KERNEL_OK")
</pallas_src>

<mosaic_0001>
module attributes {stable_mosaic.version = 11 : i64} {
  func.func @_fwd_kernel(%arg0: i32, %arg1: memref<8x32xf32, #tpu.memory_space<vmem>>, %arg2: memref<1x32xf32, #tpu.memory_space<vmem>>, %arg3: memref<1xf32, #tpu.memory_space<smem>>, %arg4: memref<1x1x8xf32, #tpu.memory_space<vmem>>) attributes {dimension_semantics = [#tpu.dimension_semantics<parallel>], iteration_bounds = array<i64: 1>, scalar_prefetch = 0 : i64, scratch_operands = 0 : i64, tpu.core_type = #tpu.core_type<tc>, window_params = [{transform_indices = @transform_0, window_bounds = array<i64: 8, 32>}, {pipeline_mode = #tpu.pipeline_mode<synchronous>, transform_indices = @transform_1, window_bounds = array<i64: 1, 32>}, {transform_indices = @transform_2, window_bounds = array<i64: 1>}, {transform_indices = @transform_3, window_bounds = array<i64: 1, 1, 8>}]} {
    %c0 = arith.constant 0 : index
    %c0_0 = arith.constant 0 : index
    %0 = vector.load %arg1[%c0, %c0_0] : memref<8x32xf32, #tpu.memory_space<vmem>>, vector<8x32xf32>
    %c0_1 = arith.constant 0 : index
    %c0_2 = arith.constant 0 : index
    %1 = vector.load %arg2[%c0_1, %c0_2] : memref<1x32xf32, #tpu.memory_space<vmem>>, vector<1x32xf32>
    %c0_3 = arith.constant 0 : index
    %2 = memref.load %arg3[%c0_3] : memref<1xf32, #tpu.memory_space<smem>>
    %3 = vector.broadcast %1 : vector<1x32xf32> to vector<8x32xf32>
    %4 = arith.mulf %0, %3 : vector<8x32xf32>
    %cst = arith.constant dense<0.000000e+00> : vector<8xf32>
    %5 = vector.multi_reduction <add>, %4, %cst [1] : vector<8x32xf32> to vector<8xf32>
    %6 = vector.broadcast %2 : f32 to vector<8xf32>
    %7 = arith.addf %5, %6 : vector<8xf32>
    %cst_4 = arith.constant 0.000000e+00 : f32
    %8 = vector.broadcast %cst_4 : f32 to vector<8xf32>
    %9 = arith.subf %8, %7 : vector<8xf32>
    %10 = math.exp %9 : vector<8xf32>
    %cst_5 = arith.constant 1.000000e+00 : f32
    %11 = vector.broadcast %cst_5 : f32 to vector<8xf32>
    %12 = arith.addf %11, %10 : vector<8xf32>
    %cst_6 = arith.constant 1.000000e+00 : f32
    %13 = vector.broadcast %cst_6 : f32 to vector<8xf32>
    %14 = arith.divf %13, %12 : vector<8xf32>
    %15 = vector.shape_cast %14 : vector<8xf32> to vector<1x1x8xf32>
    %c0_7 = arith.constant 0 : index
    %c0_8 = arith.constant 0 : index
    %c0_9 = arith.constant 0 : index
    %16 = vector.load %arg4[%c0_7, %c0_8, %c0_9] : memref<1x1x8xf32, #tpu.memory_space<vmem>>, vector<1x1x8xf32>
    tpu.vector_store %arg4[%c0_7, %c0_8, %c0_9], %15 {strides = array<i32>} : memref<1x1x8xf32, #tpu.memory_space<vmem>>, vector<1x1x8xf32>,
    return
  }
  func.func @transform_0(%arg0: i32) -> (i32, i32) {
    %c0_i32 = arith.constant 0 : i32
    %c0_i32_0 = arith.constant 0 : i32
    return %arg0, %c0_i32 : i32, i32
  }
  func.func @transform_1(%arg0: i32) -> (i32, i32) {
    %c0_i32 = arith.constant 0 : i32
    %c0_i32_0 = arith.constant 0 : i32
    %c0_i32_1 = arith.constant 0 : i32
    return %c0_i32, %c0_i32_0 : i32, i32
  }
  func.func @transform_2(%arg0: i32) -> i32 {
    %c0_i32 = arith.constant 0 : i32
    %c0_i32_0 = arith.constant 0 : i32
    return %c0_i32 : i32
  }
  func.func @transform_3(%arg0: i32) -> (i32, i32, i32) {
    %c0_i32 = arith.constant 0 : i32
    %c0_i32_0 = arith.constant 0 : i32
    %c0_i32_1 = arith.constant 0 : i32
    return %arg0, %c0_i32, %c0_i32_0 : i32, i32, i32
  }
}

</mosaic_0001>

<bundles_post_ra>
// kernel: tpu_custom_call.1
= control target key start
LH: loop header
LB: loop body
LE: loop exit
PB: predicated region body
PF: predicated region fallthrough
CT: control target
= control target key end

     0   :  { %9 = vsyncpa [#allocation4], 0  ;;  %s182_s0 = inlined_call_operand.hbm [shape: f32[8,32], index: 0, kind: input, shape index: {}]   ;;  %s183_s1 = inlined_call_operand.vmem [shape: f32[1,32], index: 1, kind: input, shape index: {}]   ;;  %s184_s2 = inlined_call_operand.<no memory space> [shape: f32[1], index: 2, kind: input, shape index: {}]   ;;  %s185_s3 = inlined_call_operand.hbm [shape: f32[1,1,8], index: 3, kind: output, shape index: {}]  }
   0x1   :  { %10 = vsyncpa [#allocation5], 0  ;;  %s130_s12 = smov [#allocation3]   ;;  %s82_s16 = scalar_lea.hbm %s182_s0, 128 }
   0x2   :  { %s17_s13 = sshll.u32 %s130_s12, 4  ;;  %p83_p0 = scmp.ne.s32.totalorder %s182_s0, %s82_s16  ;;  %s18_s13 = int_to_ptr.vmem [resolvable:$true] %s17_s13 }
   0x3   :  { %p86_p1 = scmp.lt.u32.totalorder %s82_s16, %s182_s0 }
   0x5   :  { %p88_p2 = pnand %p86_p1, %p83_p0 }
   0x7   :  { %91 = shalt.err (!%p88_p2)
}
   0x8   :  { %s92_s21 = scalar_lea.vmem %s18_s13, 128  ;;  %p97_p4 = scmp.lt.s32.totalorder %s18_s13, %s18_s13 }
   0x9   :  { %p93_p3 = scmp.ne.s32.totalorder %s18_s13, %s92_s21  ;;  %p98_p5 = scmp.lt.s32.totalorder %s92_s21, %s92_s21 }
   0xb   :  { %p99_p6 = por %p98_p5, %p97_p4 }
   0xd   :  { %p100_p7 = pnand %p99_p6, %p93_p3 }
   0xf   :  { %103 = shalt.err (!%p100_p7)
}
  0x10   :  { %20 = dma.hbm_to_vmem [thread:$0]  %s182_s0, 128, %s18_s13, [#allocation4]  }
  0x11   :  { %126 = dma.done.wait [#allocation4], 128  }
  0x12   :  { %127 = vsyncadd [#allocation4], 4294967168  ;;  %v28_v0 = vld [vmem:[#allocation3] sm:$0xff]  ;;  %vm38_vm0 = vcmask 261120   ;;  %v42_v4 = vstv %s184_s2  ;;  %v51_v11 = vlaneseq  ;;  %s131_s0 = smov [#allocation6]   ;;  %vm58_vm1 = vcmask 57344  }
  0x13   :  { %v75_v1 = vld [vmem:[%s183_s1] ss:$0 sm:$0xff]  ;;  %s66_s1 = sshll.u32 %s131_s0, 4  ;;  %s67_s1 = int_to_ptr.vmem [resolvable:$true] %s66_s1 }
  0x14   :  { %v37_v2 = vmul.f32 %v75_v1, %v28_v0  ;;  %v52_v12 = vand.u32 127, %v51_v11  ;;  %v54_v13 = vshrl.u32 %v51_v11, 7  ;;  %s104_s2 = scalar_lea.vmem %s67_s1, 16  ;;  %s108_s28 = scalar_lea.vmem %s67_s1, 32 }
  0x15   :  { %p105_p8 = scmp.ne.s32.totalorder %s67_s1, %s104_s2  ;;  %p109_p9 = scmp.lt.s32.totalorder %s67_s1, %s67_s1 }
  0x16   :  { %v39_v3 = vsel %vm38_vm0, %v37_v2, 0.0  ;;  %v55_v14 = vsub.s32 %v52_v12, %v54_v13  ;;  %p110_p10 = scmp.lt.s32.totalorder %s108_s28, %s104_s2 }
  0x17   :  { %40 = vadd.xlane.f32.xlu0 %v39_v3 }
  0x18   :  { %p111_p11 = por %p110_p10, %p109_p9 }
  0x1a   :  { %p112_p12 = pnand %p111_p11, %p105_p8 }
  0xa4   :  { %v41_v5 = vpop.xlane.xlu0 %40 }
  0xa5   :  { %v43_v6 = vadd.f32 %v42_v4, %v41_v5 }
  0xa7   :  { %v44_v7 = vsub.f32 0.0, %v43_v6 }
  0xa9   :  { %v45_v8 = vmul.f32 1.442695, %v44_v7 }
  0xab   :  { %78 = vpow2.f32 %v45_v8 }
  0xb5   :  { %v79_v9 = vpop.eup %78 }
  0xb6   :  { %v47_v10 = vadd.f32 1.0, %v79_v9 }
  0xb8   :  { %80 = vrcp.f32 %v47_v10 }
  0xc2   :  { %v81_v15 = vpop.eup %80 }
  0xc3   :  { %v56_v16 = vrot.slane %v81_v15, %v55_v14 }
  0xc5   :  { %59 = vst.msk [vmem:[#allocation6] sm:$0x1] %vm58_vm1, %v56_v16 }
  0xc6   :  { %115 = shalt.err (!%p112_p12)
}
  0xc7   :  { %s116_s4 = scalar_lea.hbm %s185_s3, 16 }
  0xc8   :  { %p117_p13 = scmp.ne.s32.totalorder %s185_s3, %s116_s4  ;;  %p120_p0 = scmp.lt.u32.totalorder %s116_s4, %s185_s3 }
  0xca   :  { %p122_p1 = pnand %p120_p0, %p117_p13 }
  0xcc   :  { %125 = shalt.err (!%p122_p1)
}
  0xcd   :  { %69 = dma.vmem_to_hbm [thread:$0]  %s67_s1, 16, %s185_s3, [#allocation5]  }
  0xce   :  { %128 = dma.done.wait [#allocation5], 16  }
  0xcf   :  { %129 = vsyncadd [#allocation5], 4294967280 }
  0xd0   :  { %73 = vsyncpa [#allocation4], 1 }
  0xd1   :  { %74 = vsyncpa [#allocation5], 1 }

</bundles_post_ra>
